<compile_context>
chip_gen: v7x
topology: tpu7x:2x2x1
jax: 0.10.0
libtpu: 0.0.40
codegen_flags: <defaults>
</compile_context>

<pallas_src>
import jax
import jax.numpy as jnp
from jax.experimental import pallas as pl
from jax.experimental.pallas import tpu as pltpu


def _round_up(x, m):
    return ((x + m - 1) // m) * m


def head_kernel(x_ref, w1_ref, b1_ref, w2_ref, b2_ref, o_ref):
    # x tile arrives bf16 from the producer; MXU accumulates in f32.
    # Linear(in_f, 512) with BN1 pre-folded into W1'/b1'.
    h = jnp.dot(x_ref[...], w1_ref[...], preferred_element_type=jnp.float32) + b1_ref[...]

    # ReLU in f32 on the VPU (v5e-safe: no bf16 VPU there).
    h = jnp.maximum(h, 0.0)

    # Linear(512, out_pad) with BN2 pre-folded into W2'/b2'.
    o_ref[...] = (jnp.dot(h.astype(jnp.bfloat16), w2_ref[...],
                          preferred_element_type=jnp.float32) + b2_ref[...])


def head_forward(x_nchw, params):
    """x_nchw: (B, C, H, W), ideally already bfloat16 (producer-side dtype).
    params: folded (W1', b1', W2', b2').  Returns (B, out_f) float32."""
    w1, b1, w2, b2 = params          # w1:(in_f,hid) bf16, b1:(1,hid) f32, w2:(hid,out_f) bf16, b2:(1,out_f) f32
    B = x_nchw.shape[0]
    x2d = x_nchw.reshape(B, -1)      # nn.Flatten (NCHW row-major)
    if x2d.dtype != jnp.bfloat16:
        # Producer should feed bf16 activations; fall back rather than fail.
        x2d = x2d.astype(jnp.bfloat16)
    in_f = x2d.shape[1]
    hidden = w1.shape[1]
    out_f = w2.shape[1]

    # Batch tile: multiple of 16 sublanes (bf16 packing), capped at 1024.
    # (For very large B, TB=1024 is also a 256-multiple -> clean M passes on the 256-wide MXU.)
    SUB = 16
    TB = min(1024, _round_up(B, SUB))
    B_pad = _round_up(B, TB)

    # v7x megacore: make sure the parallel grid axis has >=2 steps when the batch allows it,
    # so both TensorCores get work.
    if B_pad // TB == 1 and B_pad >= 2 * SUB:
        TB = _round_up(pl.cdiv(B_pad, 2), SUB)
        B_pad = _round_up(B, TB)

    # Lane-dense output: pad out features to a multiple of 128 (unmasked stores).
    out_pad = _round_up(out_f, 128)

    if B_pad != B:
        x2d = jnp.pad(x2d, ((0, B_pad - B), (0, 0)))
    if out_pad != out_f:
        w2 = jnp.pad(w2, ((0, 0), (0, out_pad - out_f)))
        b2 = jnp.pad(b2, ((0, 0), (0, out_pad - out_f)))

    grid = (B_pad // TB,)

    # Only raise the scoped-VMEM limit when the real footprint (double-buffered x/out tiles +
    # double-buffered resident weights) actually exceeds the ~32 MiB default.
    footprint = (2 * (TB * in_f * 2 + TB * out_pad * 4)
                 + 2 * (in_f * hidden * 2 + hidden * 4 + hidden * out_pad * 2 + out_pad * 4))
    cp_kwargs = dict(dimension_semantics=("parallel",))
    if footprint > 30 * 1024 * 1024:
        cp_kwargs["vmem_limit_bytes"] = int(footprint * 5 // 4)

    out = pl.pallas_call(
        head_kernel,
        out_shape=jax.ShapeDtypeStruct((B_pad, out_pad), jnp.float32),
        grid=grid,
        in_specs=[
            pl.BlockSpec((TB, in_f), lambda i: (i, 0)),        # x tile (pipelined, bf16)
            pl.BlockSpec((in_f, hidden), lambda i: (0, 0)),    # W1' resident (bf16)
            pl.BlockSpec((1, hidden), lambda i: (0, 0)),       # b1' resident (f32)
            pl.BlockSpec((hidden, out_pad), lambda i: (0, 0)), # W2' resident (bf16)
            pl.BlockSpec((1, out_pad), lambda i: (0, 0)),      # b2' resident (f32)
        ],
        out_specs=pl.BlockSpec((TB, out_pad), lambda i: (i, 0)),
        compiler_params=pltpu.CompilerParams(**cp_kwargs),
    )(x2d, w1, b1, w2, b2)

    return out[:B, :out_f]


def init_params(key, in_f, hidden, out_f):
    """Deterministic synthetic parameters matching the nn.Module shapes (raw, unfolded)."""
    k = jax.random.split(key, 8)

    # nn.Linear(in_f, 512): weight (512, in_f), bias (512,)
    lim1 = 1.0 / jnp.sqrt(in_f)
    w1 = jax.random.uniform(k[0], (hidden, in_f), jnp.float32, -lim1, lim1)
    b1 = jax.random.uniform(k[1], (hidden,), jnp.float32, -lim1, lim1)

    # nn.Linear(512, out_f)
    lim2 = 1.0 / jnp.sqrt(hidden)
    w2 = jax.random.uniform(k[2], (out_f, hidden), jnp.float32, -lim2, lim2)
    b2 = jax.random.uniform(k[3], (out_f,), jnp.float32, -lim2, lim2)

    # nn.BatchNorm1d(in_f): gamma, beta, running_mean, running_var
    g1 = jnp.ones((in_f,), jnp.float32)
    be1 = jnp.zeros((in_f,), jnp.float32)
    rm1 = 0.1 * jax.random.normal(k[4], (in_f,), jnp.float32)
    rv1 = 1.0 + 0.1 * jnp.abs(jax.random.normal(k[5], (in_f,), jnp.float32))

    # nn.BatchNorm1d(512)
    g2 = jnp.ones((hidden,), jnp.float32)
    be2 = jnp.zeros((hidden,), jnp.float32)
    rm2 = 0.1 * jax.random.normal(k[6], (hidden,), jnp.float32)
    rv2 = 1.0 + 0.1 * jnp.abs(jax.random.normal(k[7], (hidden,), jnp.float32))

    return (w1, b1, w2, b2, g1, be1, rm1, rv1, g2, be2, rm2, rv2)


def fold_params(raw, eps=1e-5):
    """Fold eval-mode BatchNorms into the adjacent Linear layers; weights -> bf16."""
    (w1, b1, w2, b2, g1, be1, rm1, rv1, g2, be2, rm2, rv2) = raw
    s1 = g1 / jnp.sqrt(rv1 + eps)
    t1 = be1 - rm1 * s1
    s2 = g2 / jnp.sqrt(rv2 + eps)
    t2 = be2 - rm2 * s2

    # (x*s1 + t1) @ W1^T + b1  ==  x @ (s1[:,None]*W1^T) + (t1 @ W1^T + b1)
    w1t = w1.T                              # (in_f, hidden)
    w1f = (s1[:, None] * w1t)
    b1f = t1 @ w1t + b1

    # (h*s2 + t2) @ W2^T + b2  ==  h @ (s2[:,None]*W2^T) + (t2 @ W2^T + b2)
    w2t = w2.T                              # (hidden, out_f)
    w2f = (s2[:, None] * w2t)
    b2f = t2 @ w2t + b2

    return (w1f.astype(jnp.bfloat16), b1f.reshape(1, -1).astype(jnp.float32),
            w2f.astype(jnp.bfloat16), b2f.reshape(1, -1).astype(jnp.float32))


def reference_forward_folded(x_nchw_bf16, params):
    """Plain-JAX reference of exactly what the kernel computes (bf16 x, bf16 weights, f32 acc)."""
    w1, b1, w2, b2 = params
    x = x_nchw_bf16.reshape(x_nchw_bf16.shape[0], -1).astype(jnp.bfloat16)
    h = jnp.dot(x, w1, preferred_element_type=jnp.float32) + b1
    h = jnp.maximum(h, 0.0)
    return jnp.dot(h.astype(jnp.bfloat16), w2, preferred_element_type=jnp.float32) + b2


def reference_forward_f32(x_nchw, raw, eps=1e-5):
    """Full-precision eval-mode forward of the original PyTorch module (semantic check)."""
    (w1, b1, w2, b2, g1, be1, rm1, rv1, g2, be2, rm2, rv2) = raw
    x = x_nchw.reshape(x_nchw.shape[0], -1).astype(jnp.float32)
    x = (x - rm1) / jnp.sqrt(rv1 + eps) * g1 + be1
    h = jnp.maximum(x @ w1.T + b1, 0.0)
    h = (h - rm2) / jnp.sqrt(rv2 + eps) * g2 + be2
    return h @ w2.T + b2


if __name__ == "__main__":
    B, C, H, W = 2, 4, 16, 16          # -> in_f = 1024
    in_f = C * H * W
    hidden = 512
    out_f = 10

    key = jax.random.PRNGKey(0)
    kx, kp = jax.random.split(key)
    x = jax.random.normal(kx, (B, C, H, W), jnp.float32)
    # The producer feeds bf16 activations (interface change per the perf review).
    x_bf16 = x.astype(jnp.bfloat16)

    raw = init_params(kp, in_f, hidden, out_f)
    params = fold_params(raw)

    out = head_forward(x_bf16, params)
    jax.block_until_ready(out)
    assert out.shape == (B, out_f)

    # Exact check against a JAX reference of the same bf16-input / bf16-weight computation.
    ref = reference_forward_folded(x_bf16, params)
    assert jnp.allclose(out, ref, atol=1e-3, rtol=1e-3), "mismatch vs folded bf16 reference"

    # Semantic check against the full-precision eval-mode module forward
    # (on the same bf16-rounded input the kernel sees, so only weight precision differs).
    ref_f32 = reference_forward_f32(x_bf16.astype(jnp.float32), raw)
    assert jnp.allclose(out, ref_f32, atol=1e-1, rtol=1e-1), "mismatch vs f32 eval-mode reference"

    print("KERNEL_OK")
</pallas_src>

<mosaic_0001>
module attributes {stable_mosaic.version = 11 : i64} {
  func.func @head_kernel(%arg0: i32, %arg1: memref<16x1024xbf16, #tpu.memory_space<vmem>>, %arg2: memref<1024x512xbf16, #tpu.memory_space<vmem>>, %arg3: memref<1x512xf32, #tpu.memory_space<vmem>>, %arg4: memref<512x128xbf16, #tpu.memory_space<vmem>>, %arg5: memref<1x128xf32, #tpu.memory_space<vmem>>, %arg6: memref<16x128xf32, #tpu.memory_space<vmem>>) attributes {dimension_semantics = [#tpu.dimension_semantics<parallel>], iteration_bounds = array<i64: 1>, scalar_prefetch = 0 : i64, scratch_operands = 0 : i64, tpu.core_type = #tpu.core_type<tc>, window_params = [{transform_indices = @transform_0, window_bounds = array<i64: 16, 1024>}, {pipeline_mode = #tpu.pipeline_mode<synchronous>, transform_indices = @transform_1, window_bounds = array<i64: 1024, 512>}, {pipeline_mode = #tpu.pipeline_mode<synchronous>, transform_indices = @transform_2, window_bounds = array<i64: 1, 512>}, {pipeline_mode = #tpu.pipeline_mode<synchronous>, transform_indices = @transform_3, window_bounds = array<i64: 512, 128>}, {pipeline_mode = #tpu.pipeline_mode<synchronous>, transform_indices = @transform_4, window_bounds = array<i64: 1, 128>}, {transform_indices = @transform_5, window_bounds = array<i64: 16, 128>}]} {
    %c0 = arith.constant 0 : index
    %c0_0 = arith.constant 0 : index
    %0 = vector.load %arg1[%c0, %c0_0] : memref<16x1024xbf16, #tpu.memory_space<vmem>>, vector<16x1024xbf16>
    %c0_1 = arith.constant 0 : index
    %c0_2 = arith.constant 0 : index
    %1 = vector.load %arg2[%c0_1, %c0_2] : memref<1024x512xbf16, #tpu.memory_space<vmem>>, vector<1024x512xbf16>
    %cst = arith.constant dense<0.000000e+00> : vector<16x512xf32>
    %2 = tpu.matmul %0, %1, %cst {dimension_numbers = #tpu.dot_dimension_numbers<[1], [0], [0], [1], [0, 0, 1, 1], [], []>} : vector<16x1024xbf16>, vector<1024x512xbf16>, vector<16x512xf32> -> vector<16x512xf32>
    %c0_3 = arith.constant 0 : index
    %c0_4 = arith.constant 0 : index
    %3 = vector.load %arg3[%c0_3, %c0_4] : memref<1x512xf32, #tpu.memory_space<vmem>>, vector<1x512xf32>
    %4 = vector.broadcast %3 : vector<1x512xf32> to vector<16x512xf32>
    %5 = arith.addf %2, %4 : vector<16x512xf32>
    %cst_5 = arith.constant 0.000000e+00 : f32
    %6 = vector.broadcast %cst_5 : f32 to vector<16x512xf32>
    %7 = arith.maximumf %5, %6 : vector<16x512xf32>
    %8 = arith.truncf %7 : vector<16x512xf32> to vector<16x512xbf16>
    %c0_6 = arith.constant 0 : index
    %c0_7 = arith.constant 0 : index
    %9 = vector.load %arg4[%c0_6, %c0_7] : memref<512x128xbf16, #tpu.memory_space<vmem>>, vector<512x128xbf16>
    %cst_8 = arith.constant dense<0.000000e+00> : vector<16x128xf32>
    %10 = tpu.matmul %8, %9, %cst_8 {dimension_numbers = #tpu.dot_dimension_numbers<[1], [0], [0], [1], [0, 0, 1, 1], [], []>} : vector<16x512xbf16>, vector<512x128xbf16>, vector<16x128xf32> -> vector<16x128xf32>
    %c0_9 = arith.constant 0 : index
    %c0_10 = arith.constant 0 : index
    %11 = vector.load %arg5[%c0_9, %c0_10] : memref<1x128xf32, #tpu.memory_space<vmem>>, vector<1x128xf32>
    %12 = vector.broadcast %11 : vector<1x128xf32> to vector<16x128xf32>
    %13 = arith.addf %10, %12 : vector<16x128xf32>
    %c0_11 = arith.constant 0 : index
    %c0_12 = arith.constant 0 : index
    %14 = vector.load %arg6[%c0_11, %c0_12] : memref<16x128xf32, #tpu.memory_space<vmem>>, vector<16x128xf32>
    tpu.vector_store %arg6[%c0_11, %c0_12], %13 {strides = array<i32>} : memref<16x128xf32, #tpu.memory_space<vmem>>, vector<16x128xf32>,
    return
  }
  func.func @transform_0(%arg0: i32) -> (i32, i32) {
    %c0_i32 = arith.constant 0 : i32
    %c0_i32_0 = arith.constant 0 : i32
    return %arg0, %c0_i32 : i32, i32
  }
  func.func @transform_1(%arg0: i32) -> (i32, i32) {
    %c0_i32 = arith.constant 0 : i32
    %c0_i32_0 = arith.constant 0 : i32
    %c0_i32_1 = arith.constant 0 : i32
    return %c0_i32, %c0_i32_0 : i32, i32
  }
  func.func @transform_2(%arg0: i32) -> (i32, i32) {
    %c0_i32 = arith.constant 0 : i32
    %c0_i32_0 = arith.constant 0 : i32
    %c0_i32_1 = arith.constant 0 : i32
    return %c0_i32, %c0_i32_0 : i32, i32
  }
  func.func @transform_3(%arg0: i32) -> (i32, i32) {
    %c0_i32 = arith.constant 0 : i32
    %c0_i32_0 = arith.constant 0 : i32
    %c0_i32_1 = arith.constant 0 : i32
    return %c0_i32, %c0_i32_0 : i32, i32
  }
  func.func @transform_4(%arg0: i32) -> (i32, i32) {
    %c0_i32 = arith.constant 0 : i32
    %c0_i32_0 = arith.constant 0 : i32
    %c0_i32_1 = arith.constant 0 : i32
    return %c0_i32, %c0_i32_0 : i32, i32
  }
  func.func @transform_5(%arg0: i32) -> (i32, i32) {
    %c0_i32 = arith.constant 0 : i32
    %c0_i32_0 = arith.constant 0 : i32
    return %arg0, %c0_i32 : i32, i32
  }
}

</mosaic_0001>

<bundles_post_ra>
// kernel: tpu_custom_call.1
= control target key start
LH: loop header
LB: loop body
LE: loop exit
PB: predicated region body
PF: predicated region fallthrough
CT: control target
= control target key end

     0   :  { %10 = vsyncpa [#allocation3], 0  ;;  %s3405_s0 = inlined_call_operand.hbm [shape: bf16[16,1024], index: 0, kind: input, shape index: {}]   ;;  %s3406_s1 = inlined_call_operand.hbm [shape: bf16[1024,512], index: 1, kind: input, shape index: {}]   ;;  %s3407_s2 = inlined_call_operand.vmem [shape: f32[1,512], index: 2, kind: input, shape index: {}]   ;;  %s3408_s3 = inlined_call_operand.hbm [shape: bf16[512,128], index: 3, kind: input, shape index: {}]   ;;  %s3409_s4 = inlined_call_operand.vmem [shape: f32[1,128], index: 4, kind: input, shape index: {}]   ;;  %s3410_s5 = inlined_call_operand.hbm [shape: f32[16,128], index: 5, kind: output, shape index: {}]  }
   0x1   :  { %11 = vsyncpa [#allocation6], 0 }
   0x2   :  { %12 = vsyncpa [#allocation4], 0  ;;  %s3285_s18 = smov [#allocation5]   ;;  %s3191_s22 = scalar_lea.hbm %s3406_s1, 32768 }
   0x3   :  { %s30_s19 = sshll.u32 %s3285_s18, 4  ;;  %p3192_p0 = scmp.ne.s32.totalorder %s3406_s1, %s3191_s22  ;;  %s31_s19 = int_to_ptr.vmem [resolvable:$true] %s30_s19 }
   0x4   :  { %p3195_p1 = scmp.lt.u32.totalorder %s3191_s22, %s3406_s1 }
   0x6   :  { %p3197_p2 = pnand %p3195_p1, %p3192_p0 }
   0x8   :  { %3200 = shalt.err (!%p3197_p2)
}
   0x9   :  { %s3201_s27 = scalar_lea.vmem %s31_s19, 32768  ;;  %p3206_p4 = scmp.lt.s32.totalorder %s31_s19, %s31_s19 }
   0xa   :  { %p3202_p3 = scmp.ne.s32.totalorder %s31_s19, %s3201_s27  ;;  %p3207_p5 = scmp.lt.s32.totalorder %s3201_s27, %s3201_s27 }
   0xc   :  { %p3208_p6 = por %p3207_p5, %p3206_p4 }
   0xe   :  { %p3209_p7 = pnand %p3208_p6, %p3202_p3 }
  0x10   :  { %3212 = shalt.err (!%p3209_p7)
}
  0x11   :  { %s3286_s28 = smov 256   ;;  %s3287_s29 = smov 16  }
  0x12   :  { %36 = dma.hbm_to_vmem [thread:$0]  %s3406_s1, 32768, %s31_s19, [#allocation6], %s3286_s28, %s3286_s28, %s3287_s29  }
  0x13   :  { %s3288_s7 = smov [#allocation2]   ;;  %s3213_s11 = scalar_lea.hbm %s3405_s0, 1024 }
  0x14   :  { %s18_s8 = sshll.u32 %s3288_s7, 4  ;;  %p3214_p8 = scmp.ne.s32.totalorder %s3405_s0, %s3213_s11  ;;  %s19_s8 = int_to_ptr.vmem [resolvable:$true] %s18_s8 }
  0x15   :  { %p3217_p9 = scmp.lt.u32.totalorder %s3213_s11, %s3405_s0 }
  0x17   :  { %p3219_p10 = pnand %p3217_p9, %p3214_p8 }
  0x19   :  { %3222 = shalt.err (!%p3219_p10)
}
  0x1a   :  { %s3223_s16 = scalar_lea.vmem %s19_s8, 1024  ;;  %p3228_p12 = scmp.lt.s32.totalorder %s19_s8, %s19_s8 }
  0x1b   :  { %p3224_p11 = scmp.ne.s32.totalorder %s19_s8, %s3223_s16  ;;  %p3229_p13 = scmp.lt.s32.totalorder %s3223_s16, %s3223_s16 }
  0x1d   :  { %p3230_p0 = por %p3229_p13, %p3228_p12 }
  0x1f   :  { %p3231_p1 = pnand %p3230_p0, %p3224_p11 }
  0x21   :  { %3234 = shalt.err (!%p3231_p1)
}
  0x22   :  { %s3289_s1 = smov 512   ;;  %s3290_s17 = smov 32  }
  0x23   :  { %24 = dma.hbm_to_vmem [thread:$0]  %s3405_s0, 1024, %s19_s8, [#allocation3], %s3289_s1, %s3289_s1, %s3290_s17  }
  0x24   :  { %s3291_s20 = smov [#allocation7]   ;;  %s3235_s24 = scalar_lea.hbm %s3408_s3, 4096 }
  0x25   :  { %s44_s21 = sshll.u32 %s3291_s20, 4  ;;  %p3236_p2 = scmp.ne.s32.totalorder %s3408_s3, %s3235_s24  ;;  %s45_s21 = int_to_ptr.vmem [resolvable:$true] %s44_s21 }
  0x26   :  { %p3239_p3 = scmp.lt.u32.totalorder %s3235_s24, %s3408_s3 }
  0x28   :  { %p3241_p4 = pnand %p3239_p3, %p3236_p2 }
  0x2a   :  { %3244 = shalt.err (!%p3241_p4)
}
  0x2b   :  { %s3245_s29 = scalar_lea.vmem %s45_s21, 4096  ;;  %p3250_p6 = scmp.lt.s32.totalorder %s45_s21, %s45_s21 }
  0x2c   :  { %p3246_p5 = scmp.ne.s32.totalorder %s45_s21, %s3245_s29  ;;  %p3251_p7 = scmp.lt.s32.totalorder %s3245_s29, %s3245_s29 }
  0x2e   :  { %p3252_p8 = por %p3251_p7, %p3250_p6 }
  0x30   :  { %p3253_p9 = pnand %p3252_p8, %p3246_p5 }
  0x32   :  { %3256 = shalt.err (!%p3253_p9)
}
  0x33   :  { %s3292_s0 = smov 64   ;;  %s3293_s30 = smov 4  }
  0x34   :  { %50 = dma.hbm_to_vmem [thread:$0]  %s3408_s3, 4096, %s45_s21, [#allocation6], %s3292_s0, %s3292_s0, %s3293_s30  }
  0x35   :  { %3279 = dma.done.wait [#allocation3], 1024  }
  0x36   :  { %3280 = vsyncadd [#allocation3], 4294966272 }
  0x37   :  { %3281 = dma.done.wait [#allocation6], 36864  }
  0x38   :  { %3282 = vsyncadd [#allocation6], 4294930432  ;;  %v2775_v0 = vld [vmem:[#allocation5 + $0x4] ss:$16 sps:$4 sm:$0xff]   ;;  %v2777_v1 = vld [vmem:[#allocation5 + $0xc] ss:$16 sps:$4 sm:$0xff]  }
  0x39   :  { %1669 = vmatprep.subr.bf16.mxu0 %v2775_v0  ;;  %v2779_v2 = vld [vmem:[#allocation5] ss:$16 sps:$4 sm:$0xff]   ;;  %v2780_v3 = vld [vmem:[#allocation5 + $0x8] ss:$16 sps:$4 sm:$0xff]   ;;  %1841 = vmatprep.subr.bf16.mxu1 %v2777_v1  ;;  %v2781_v4 = vld [vmem:[#allocation5 + $0x24] ss:$16 sps:$4 sm:$0xff]  }
  0x3a   :  { %1670 = vmatpush1.bf16.msra.mxu0 %v2779_v2  ;;  %1842 = vmatpush1.bf16.msra.mxu1 %v2780_v3  ;;  %v2783_v5 = vld [vmem:[#allocation5 + $0x2c] ss:$16 sps:$4 sm:$0xff]   ;;  %v2785_v6 = vld [vmem:[#allocation5 + $0x20] ss:$16 sps:$4 sm:$0xff]   ;;  %v2786_v7 = vld [vmem:[#allocation5 + $0x28] ss:$16 sps:$4 sm:$0xff]  }
  0x3b   :  { %1671 = vmatprep.subr.bf16.mxu0 %v2781_v4  ;;  %1843 = vmatprep.subr.bf16.mxu1 %v2783_v5  ;;  %v2787_v8 = vld [vmem:[#allocation5 + $0x44] ss:$16 sps:$4 sm:$0xff]   ;;  %v2789_v9 = vld [vmem:[#allocation5 + $0x4c] ss:$16 sps:$4 sm:$0xff]   ;;  %v2791_v10 = vld [vmem:[#allocation5 + $0x40] ss:$16 sps:$4 sm:$0xff]  }
  0x3c   :  { %v2792_v11 = vld [vmem:[#allocation5 + $0x48] ss:$16 sps:$4 sm:$0xff]   ;;  %v2793_v12 = vld [vmem:[#allocation5 + $0x64] ss:$16 sps:$4 sm:$0xff]   ;;  %v2795_v13 = vld [vmem:[#allocation5 + $0x6c] ss:$16 sps:$4 sm:$0xff]  }
  0x3d   :  { %v2797_v14 = vld [vmem:[#allocation5 + $0x60] ss:$16 sps:$4 sm:$0xff]   ;;  %v2798_v15 = vld [vmem:[#allocation5 + $0x68] ss:$16 sps:$4 sm:$0xff]   ;;  %v2799_v16 = vld [vmem:[#allocation5 + $0x84] ss:$16 sps:$4 sm:$0xff]  }
  0x3e   :  { %1672 = vmatpush1.bf16.msra.mxu0 %v2785_v6  ;;  %1844 = vmatpush1.bf16.msra.mxu1 %v2786_v7  ;;  %v2801_v17 = vld [vmem:[#allocation5 + $0x8c] ss:$16 sps:$4 sm:$0xff]   ;;  %v2803_v18 = vld [vmem:[#allocation5 + $0x80] ss:$16 sps:$4 sm:$0xff]   ;;  %v2804_v19 = vld [vmem:[#allocation5 + $0x88] ss:$16 sps:$4 sm:$0xff]  }
  0x3f   :  { %1673 = vmatprep.subr.bf16.mxu0 %v2787_v8  ;;  %1845 = vmatprep.subr.bf16.mxu1 %v2789_v9  ;;  %v2805_v20 = vld [vmem:[#allocation5 + $0xa4] ss:$16 sps:$4 sm:$0xff]   ;;  %v2807_v21 = vld [vmem:[#allocation5 + $0xac] ss:$16 sps:$4 sm:$0xff]   ;;  %v2809_v22 = vld [vmem:[#allocation5 + $0xa0] ss:$16 sps:$4 sm:$0xff]  }
  0x40   :  { %v2810_v23 = vld [vmem:[#allocation5 + $0xa8] ss:$16 sps:$4 sm:$0xff]   ;;  %v2811_v24 = vld [vmem:[#allocation5 + $0xc4] ss:$16 sps:$4 sm:$0xff]   ;;  %v2813_v25 = vld [vmem:[#allocation5 + $0xcc] ss:$16 sps:$4 sm:$0xff]  }
  0x41   :  { %v2815_v26 = vld [vmem:[#allocation5 + $0xc0] ss:$16 sps:$4 sm:$0xff]   ;;  %v2816_v27 = vld [vmem:[#allocation5 + $0xc8] ss:$16 sps:$4 sm:$0xff]   ;;  %v2817_v28 = vld [vmem:[#allocation5 + $0xe4] ss:$16 sps:$4 sm:$0xff]  }
  0x42   :  { %1674 = vmatpush1.bf16.msra.mxu0 %v2791_v10  ;;  %1846 = vmatpush1.bf16.msra.mxu1 %v2792_v11  ;;  %v2819_v29 = vld [vmem:[#allocation5 + $0xec] ss:$16 sps:$4 sm:$0xff]   ;;  %v2821_v30 = vld [vmem:[#allocation5 + $0xe0] ss:$16 sps:$4 sm:$0xff]   ;;  %v2822_v31 = vld [vmem:[#allocation5 + $0xe8] ss:$16 sps:$4 sm:$0xff]  }
  0x43   :  { %1675 = vmatprep.subr.bf16.mxu0 %v2793_v12  ;;  %1847 = vmatprep.subr.bf16.mxu1 %v2795_v13  ;;  %v2823_v32 = vld [vmem:[#allocation5 + $0x104] ss:$16 sps:$4 sm:$0xff]   ;;  %v2825_v33 = vld [vmem:[#allocation5 + $0x10c] ss:$16 sps:$4 sm:$0xff]   ;;  %v2827_v34 = vld [vmem:[#allocation5 + $0x100] ss:$16 sps:$4 sm:$0xff]  }
  0x44   :  { %v2828_v35 = vld [vmem:[#allocation5 + $0x108] ss:$16 sps:$4 sm:$0xff]   ;;  %v2829_v36 = vld [vmem:[#allocation5 + $0x124] ss:$16 sps:$4 sm:$0xff]   ;;  %v2831_v37 = vld [vmem:[#allocation5 + $0x12c] ss:$16 sps:$4 sm:$0xff]  }
  0x45   :  { %v2833_v38 = vld [vmem:[#allocation5 + $0x120] ss:$16 sps:$4 sm:$0xff]   ;;  %v2834_v39 = vld [vmem:[#allocation5 + $0x128] ss:$16 sps:$4 sm:$0xff]   ;;  %v2835_v40 = vld [vmem:[#allocation5 + $0x144] ss:$16 sps:$4 sm:$0xff]  }
  0x46   :  { %1676 = vmatpush1.bf16.msra.mxu0 %v2797_v14  ;;  %1848 = vmatpush1.bf16.msra.mxu1 %v2798_v15  ;;  %v2837_v41 = vld [vmem:[#allocation5 + $0x14c] ss:$16 sps:$4 sm:$0xff]   ;;  %v2839_v42 = vld [vmem:[#allocation5 + $0x140] ss:$16 sps:$4 sm:$0xff]   ;;  %v2840_v43 = vld [vmem:[#allocation5 + $0x148] ss:$16 sps:$4 sm:$0xff]  }
  0x47   :  { %1677 = vmatprep.subr.bf16.mxu0 %v2799_v16  ;;  %1849 = vmatprep.subr.bf16.mxu1 %v2801_v17  ;;  %v2841_v44 = vld [vmem:[#allocation5 + $0x164] ss:$16 sps:$4 sm:$0xff]   ;;  %v2843_v45 = vld [vmem:[#allocation5 + $0x16c] ss:$16 sps:$4 sm:$0xff]   ;;  %v2845_v48 = vld [vmem:[#allocation5 + $0x160] ss:$16 sps:$4 sm:$0xff]  }
  0x48   :  { %v63_v46 = vld [vmem:[#allocation2] sm:$0xff]  ;;  %v2846_v49 = vld [vmem:[#allocation5 + $0x168] ss:$16 sps:$4 sm:$0xff]   ;;  %v2849_v52 = vld [vmem:[#allocation5 + $0x18c] ss:$16 sps:$4 sm:$0xff]   ;;  %s3294_s10 = smov [#allocation8]  }
  0x49   :  { %v67_v47 = vld [vmem:[#allocation2 + $0x20] sm:$0xff]  ;;  %v2852_v54 = vld [vmem:[#allocation5 + $0x188] ss:$16 sps:$4 sm:$0xff]   ;;  %v2855_v56 = vld [vmem:[#allocation5 + $0x1ac] ss:$16 sps:$4 sm:$0xff]   ;;  %s2377_s11 = sshll.u32 %s3294_s10, 4  ;;  %s2378_s11 = int_to_ptr.vmem [resolvable:$true] %s2377_s11 }
  0x4a   :  { %1678 = vmatpush1.bf16.msra.mxu0 %v2803_v18  ;;  %1850 = vmatpush1.bf16.msra.mxu1 %v2804_v19  ;;  %v2391_v50 = vcombine.high %v63_v46, %v67_v47  ;;  %v2847_v51 = vld [vmem:[#allocation5 + $0x184] ss:$16 sps:$4 sm:$0xff]   ;;  %v2851_v53 = vld [vmem:[#allocation5 + $0x180] ss:$16 sps:$4 sm:$0xff]   ;;  %v2858_v58 = vld [vmem:[#allocation5 + $0x1a8] ss:$16 sps:$4 sm:$0xff]   ;;  %v2390_v5 = vcombine.low %v63_v46, %v67_v47  ;;  %p3262_p11 = scmp.lt.s32.totalorder %s2378_s11, %s2378_s11 }
  0x4b   :  { %1679 = vmatprep.subr.bf16.mxu0 %v2805_v20  ;;  %1851 = vmatprep.subr.bf16.mxu1 %v2807_v21  ;;  %v2853_v55 = vld [vmem:[#allocation5 + $0x1a4] ss:$16 sps:$4 sm:$0xff]   ;;  %v2857_v57 = vld [vmem:[#allocation5 + $0x1a0] ss:$16 sps:$4 sm:$0xff]   ;;  %v2861_v60 = vld [vmem:[#allocation5 + $0x1cc] ss:$16 sps:$4 sm:$0xff]  }
  0x4c   :  { %1701 = vmatprep.mubr.bf16.mxu0 %v2391_v50  ;;  %1873 = vmatprep.mubr.bf16.mxu1 %v2391_v50  ;;  %v2859_v59 = vld [vmem:[#allocation5 + $0x1c4] ss:$16 sps:$4 sm:$0xff]   ;;  %v2863_v61 = vld [vmem:[#allocation5 + $0x1c0] ss:$16 sps:$4 sm:$0xff]   ;;  %v2864_v62 = vld [vmem:[#allocation5 + $0x1c8] ss:$16 sps:$4 sm:$0xff]  }
  0x4d   :  { %v2865_v63 = vld [vmem:[#allocation5 + $0x1e4] ss:$16 sps:$4 sm:$0xff]   ;;  %v2867_v0 = vld [vmem:[#allocation5 + $0x1ec] ss:$16 sps:$4 sm:$0xff]   ;;  %v2869_v1 = vld [vmem:[#allocation5 + $0x1e0] ss:$16 sps:$4 sm:$0xff]  }
  0x4e   :  { %1680 = vmatpush1.bf16.msra.mxu0 %v2809_v22  ;;  %1852 = vmatpush1.bf16.msra.mxu1 %v2810_v23  ;;  %v2870_v2 = vld [vmem:[#allocation5 + $0x1e8] ss:$16 sps:$4 sm:$0xff]   ;;  %v2873_v3 = vld [vmem:[#allocation5 + $0x204] ss:$16 sps:$4 sm:$0xff]   ;;  %v2876_v4 = vld [vmem:[#allocation5 + $0x20c] ss:$16 sps:$4 sm:$0xff]  }
  0x4f   :  { %1681 = vmatprep.subr.bf16.mxu0 %v2811_v24  ;;  %1853 = vmatprep.subr.bf16.mxu1 %v2813_v25  ;;  %v2871_v6 = vld [vmem:[#allocation5 + $0x200] ss:$16 sps:$4 sm:$0xff]   ;;  %v2874_v7 = vld [vmem:[#allocation5 + $0x208] ss:$16 sps:$4 sm:$0xff]   ;;  %v2879_v8 = vld [vmem:[#allocation5 + $0x224] ss:$16 sps:$4 sm:$0xff]  }
  0x50   :  { %v2882_v9 = vld [vmem:[#allocation5 + $0x22c] ss:$16 sps:$4 sm:$0xff]   ;;  %v2877_v10 = vld [vmem:[#allocation5 + $0x220] ss:$16 sps:$4 sm:$0xff]   ;;  %v2880_v11 = vld [vmem:[#allocation5 + $0x228] ss:$16 sps:$4 sm:$0xff]  }
  0x51   :  { %v2885_v12 = vld [vmem:[#allocation5 + $0x244] ss:$16 sps:$4 sm:$0xff]   ;;  %v2888_v13 = vld [vmem:[#allocation5 + $0x24c] ss:$16 sps:$4 sm:$0xff]   ;;  %v2883_v14 = vld [vmem:[#allocation5 + $0x240] ss:$16 sps:$4 sm:$0xff]  }
  0x52   :  { %1682 = vmatpush1.bf16.msra.mxu0 %v2815_v26  ;;  %1854 = vmatpush1.bf16.msra.mxu1 %v2816_v27  ;;  %v2886_v15 = vld [vmem:[#allocation5 + $0x248] ss:$16 sps:$4 sm:$0xff]   ;;  %v2891_v16 = vld [vmem:[#allocation5 + $0x264] ss:$16 sps:$4 sm:$0xff]   ;;  %v2894_v17 = vld [vmem:[#allocation5 + $0x26c] ss:$16 sps:$4 sm:$0xff]  }
  0x53   :  { %1683 = vmatprep.subr.bf16.mxu0 %v2817_v28  ;;  %1855 = vmatprep.subr.bf16.mxu1 %v2819_v29  ;;  %v2889_v18 = vld [vmem:[#allocation5 + $0x260] ss:$16 sps:$4 sm:$0xff]   ;;  %v2892_v19 = vld [vmem:[#allocation5 + $0x268] ss:$16 sps:$4 sm:$0xff]   ;;  %v2897_v20 = vld [vmem:[#allocation5 + $0x284] ss:$16 sps:$4 sm:$0xff]  }
  0x54   :  { %v2900_v21 = vld [vmem:[#allocation5 + $0x28c] ss:$16 sps:$4 sm:$0xff]   ;;  %v2895_v22 = vld [vmem:[#allocation5 + $0x280] ss:$16 sps:$4 sm:$0xff]   ;;  %v2898_v23 = vld [vmem:[#allocation5 + $0x288] ss:$16 sps:$4 sm:$0xff]  }
  0x55   :  { %v2903_v24 = vld [vmem:[#allocation5 + $0x2a4] ss:$16 sps:$4 sm:$0xff]   ;;  %v2906_v25 = vld [vmem:[#allocation5 + $0x2ac] ss:$16 sps:$4 sm:$0xff]   ;;  %v2901_v26 = vld [vmem:[#allocation5 + $0x2a0] ss:$16 sps:$4 sm:$0xff]  }
  0x56   :  { %1684 = vmatpush1.bf16.msra.mxu0 %v2821_v30  ;;  %1856 = vmatpush1.bf16.msra.mxu1 %v2822_v31  ;;  %v2904_v27 = vld [vmem:[#allocation5 + $0x2a8] ss:$16 sps:$4 sm:$0xff]   ;;  %v2909_v28 = vld [vmem:[#allocation5 + $0x2c4] ss:$16 sps:$4 sm:$0xff]   ;;  %v2912_v29 = vld [vmem:[#allocation5 + $0x2cc] ss:$16 sps:$4 sm:$0xff]  }
  0x57   :  { %1685 = vmatprep.subr.bf16.mxu0 %v2823_v32  ;;  %1857 = vmatprep.subr.bf16.mxu1 %v2825_v33  ;;  %v3363_v30 = vld [vmem:[#allocation2 + $0x8] sm:$0xff]  ;;  %v2907_v32 = vld [vmem:[#allocation5 + $0x2c0] ss:$16 sps:$4 sm:$0xff]   ;;  %v2933_v47 = vld [vmem:[#allocation5 + $0x344] ss:$16 sps:$4 sm:$0xff]  }
  0x58   :  { %v3365_v31 = vld [vmem:[#allocation2 + $0x28] sm:$0xff] }
  0x59   :  { %v2910_v33 = vld [vmem:[#allocation5 + $0x2c8] ss:$16 sps:$4 sm:$0xff]  }
  0x5a   :  { %1686 = vmatpush1.bf16.msra.mxu0 %v2827_v34  ;;  %1858 = vmatpush1.bf16.msra.mxu1 %v2828_v35  ;;  %v2393_v34 = vcombine.high %v3363_v30, %v3365_v31  ;;  %v2915_v35 = vld [vmem:[#allocation5 + $0x2e4] ss:$16 sps:$4 sm:$0xff]   ;;  %v2928_v46 = vld [vmem:[#allocation5 + $0x328] ss:$16 sps:$4 sm:$0xff]  }
  0x5b   :  { %1687 = vmatprep.subr.bf16.mxu0 %v2829_v36  ;;  %1859 = vmatprep.subr.bf16.mxu1 %v2831_v37  ;;  %v2918_v36 = vld [vmem:[#allocation5 + $0x2ec] ss:$16 sps:$4 sm:$0xff]   ;;  %v2913_v37 = vld [vmem:[#allocation5 + $0x2e0] ss:$16 sps:$4 sm:$0xff]   ;;  %v2934_v50 = vld [vmem:[#allocation5 + $0x348] ss:$16 sps:$4 sm:$0xff]  }
  0x5e   :  { %1688 = vmatpush1.bf16.msra.mxu0 %v2833_v38  ;;  %1860 = vmatpush1.bf16.msra.mxu1 %v2834_v39  ;;  %v2916_v38 = vld [vmem:[#allocation5 + $0x2e8] ss:$16 sps:$4 sm:$0xff]   ;;  %v2921_v39 = vld [vmem:[#allocation5 + $0x304] ss:$16 sps:$4 sm:$0xff]  }
  0x5f   :  { %1689 = vmatprep.subr.bf16.mxu0 %v2835_v40  ;;  %1861 = vmatprep.subr.bf16.mxu1 %v2837_v41  ;;  %v2924_v40 = vld [vmem:[#allocation5 + $0x30c] ss:$16 sps:$4 sm:$0xff]   ;;  %v2919_v41 = vld [vmem:[#allocation5 + $0x300] ss:$16 sps:$4 sm:$0xff]  }
  0x62   :  { %1690 = vmatpush1.bf16.msra.mxu0 %v2839_v42  ;;  %1862 = vmatpush1.bf16.msra.mxu1 %v2840_v43  ;;  %v2922_v42 = vld [vmem:[#allocation5 + $0x308] ss:$16 sps:$4 sm:$0xff]   ;;  %v2927_v43 = vld [vmem:[#allocation5 + $0x324] ss:$16 sps:$4 sm:$0xff]  }
  0x63   :  { %1691 = vmatprep.subr.bf16.mxu0 %v2841_v44  ;;  %1863 = vmatprep.subr.bf16.mxu1 %v2843_v45  ;;  %v2930_v44 = vld [vmem:[#allocation5 + $0x32c] ss:$16 sps:$4 sm:$0xff]   ;;  %v2925_v45 = vld [vmem:[#allocation5 + $0x320] ss:$16 sps:$4 sm:$0xff]  }
  0x66   :  { %1692 = vmatpush1.bf16.msra.mxu0 %v2845_v48  ;;  %1864 = vmatpush1.bf16.msra.mxu1 %v2846_v49  ;;  %v2936_v48 = vld [vmem:[#allocation5 + $0x34c] ss:$16 sps:$4 sm:$0xff]   ;;  %v2931_v49 = vld [vmem:[#allocation5 + $0x340] ss:$16 sps:$4 sm:$0xff]  }
  0x67   :  { %1693 = vmatprep.subr.bf16.mxu0 %v2847_v51  ;;  %1865 = vmatprep.subr.bf16.mxu1 %v2849_v52  ;;  %v2939_v51 = vld [vmem:[#allocation5 + $0x364] ss:$16 sps:$4 sm:$0xff]   ;;  %v2942_v52 = vld [vmem:[#allocation5 + $0x36c] ss:$16 sps:$4 sm:$0xff]  }
  0x6a   :  { %1694 = vmatpush1.bf16.msra.mxu0 %v2851_v53  ;;  %1866 = vmatpush1.bf16.msra.mxu1 %v2852_v54  ;;  %v2937_v53 = vld [vmem:[#allocation5 + $0x360] ss:$16 sps:$4 sm:$0xff]   ;;  %v2940_v54 = vld [vmem:[#allocation5 + $0x368] ss:$16 sps:$4 sm:$0xff]  }
  0x6b   :  { %1695 = vmatprep.subr.bf16.mxu0 %v2853_v55  ;;  %1867 = vmatprep.subr.bf16.mxu1 %v2855_v56  ;;  %v2945_v55 = vld [vmem:[#allocation5 + $0x384] ss:$16 sps:$4 sm:$0xff]   ;;  %v2948_v56 = vld [vmem:[#allocation5 + $0x38c] ss:$16 sps:$4 sm:$0xff]  }
  0x6e   :  { %1696 = vmatpush1.bf16.msra.mxu0 %v2857_v57  ;;  %1868 = vmatpush1.bf16.msra.mxu1 %v2858_v58  ;;  %v2943_v57 = vld [vmem:[#allocation5 + $0x380] ss:$16 sps:$4 sm:$0xff]   ;;  %v2946_v58 = vld [vmem:[#allocation5 + $0x388] ss:$16 sps:$4 sm:$0xff]  }
  0x6f   :  { %1697 = vmatprep.subr.bf16.mxu0 %v2859_v59  ;;  %1869 = vmatprep.subr.bf16.mxu1 %v2861_v60  ;;  %v2951_v59 = vld [vmem:[#allocation5 + $0x3a4] ss:$16 sps:$4 sm:$0xff]   ;;  %v2954_v60 = vld [vmem:[#allocation5 + $0x3ac] ss:$16 sps:$4 sm:$0xff]  }
  0x72   :  { %1698 = vmatpush1.bf16.msra.mxu0 %v2863_v61  ;;  %1870 = vmatpush1.bf16.msra.mxu1 %v2864_v62  ;;  %v2949_v61 = vld [vmem:[#allocation5 + $0x3a0] ss:$16 sps:$4 sm:$0xff]   ;;  %v2952_v62 = vld [vmem:[#allocation5 + $0x3a8] ss:$16 sps:$4 sm:$0xff]  }
  0x73   :  { %1699 = vmatprep.subr.bf16.mxu0 %v2865_v63  ;;  %1871 = vmatprep.subr.bf16.mxu1 %v2867_v0  ;;  %v2957_v63 = vld [vmem:[#allocation5 + $0x3c4] ss:$16 sps:$4 sm:$0xff]   ;;  %v2960_v0 = vld [vmem:[#allocation5 + $0x3cc] ss:$16 sps:$4 sm:$0xff]  }
  0x76   :  { %1700 = vmatpush1.bf16.msra.mxu0 %v2869_v1  ;;  %1872 = vmatpush1.bf16.msra.mxu1 %v2870_v2  ;;  %v2955_v1 = vld [vmem:[#allocation5 + $0x3c0] ss:$16 sps:$4 sm:$0xff]   ;;  %v2958_v2 = vld [vmem:[#allocation5 + $0x3c8] ss:$16 sps:$4 sm:$0xff]  }
  0x77   :  { %1712 = vmatprep.subr.bf16.mxu0 %v2873_v3  ;;  %1884 = vmatprep.subr.bf16.mxu1 %v2876_v4  ;;  %v2963_v3 = vld [vmem:[#allocation5 + $0x3e4] ss:$16 sps:$4 sm:$0xff]   ;;  %v2966_v4 = vld [vmem:[#allocation5 + $0x3ec] ss:$16 sps:$4 sm:$0xff]  }
  0x79   :  { %1702 = vmatmul.mubr.bf16.vlgmr.msra.gmra.mrb[0].mxu0 %v2390_v5  ;;  %1874 = vmatmul.mubr.bf16.vlgmr.msra.gmra.mrb[0].mxu1 %v2390_v5  ;;  %v2961_v5 = vld [vmem:[#allocation5 + $0x3e0] ss:$16 sps:$4 sm:$0xff]  }
  0x7a   :  { %1713 = vmatpush1.bf16.msra.mxu0 %v2871_v6  ;;  %1885 = vmatpush1.bf16.msra.mxu1 %v2874_v7  ;;  %v2964_v6 = vld [vmem:[#allocation5 + $0x3e8] ss:$16 sps:$4 sm:$0xff]   ;;  %v2969_v7 = vld [vmem:[#allocation5 + $0x404] ss:$16 sps:$4 sm:$0xff]  }
  0x7b   :  { %1714 = vmatprep.subr.bf16.mxu0 %v2879_v8  ;;  %1886 = vmatprep.subr.bf16.mxu1 %v2882_v9  ;;  %v2972_v8 = vld [vmem:[#allocation5 + $0x40c] ss:$16 sps:$4 sm:$0xff]   ;;  %v2392_v9 = vcombine.low %v3363_v30, %v3365_v31  ;;  %v2994_v30 = vld [vmem:[#allocation5 + $0x488] ss:$16 sps:$4 sm:$0xff]   ;;  %v2999_v31 = vld [vmem:[#allocation5 + $0x4a4] ss:$16 sps:$4 sm:$0xff]  }
  0x7c   :  { %1744 = vmatprep.mubr.bf16.mxu0 %v2393_v34  ;;  %1916 = vmatprep.mubr.bf16.mxu1 %v2393_v34  ;;  %v3000_v34 = vld [vmem:[#allocation5 + $0x4a8] ss:$16 sps:$4 sm:$0xff]  }
  0x7e   :  { %1715 = vmatpush1.bf16.msra.mxu0 %v2877_v10  ;;  %1887 = vmatpush1.bf16.msra.mxu1 %v2880_v11  ;;  %v2967_v10 = vld [vmem:[#allocation5 + $0x400] ss:$16 sps:$4 sm:$0xff]   ;;  %v2970_v11 = vld [vmem:[#allocation5 + $0x408] ss:$16 sps:$4 sm:$0xff]  }
  0x7f   :  { %1716 = vmatprep.subr.bf16.mxu0 %v2885_v12  ;;  %1888 = vmatprep.subr.bf16.mxu1 %v2888_v13  ;;  %v2975_v12 = vld [vmem:[#allocation5 + $0x424] ss:$16 sps:$4 sm:$0xff]   ;;  %v2978_v13 = vld [vmem:[#allocation5 + $0x42c] ss:$16 sps:$4 sm:$0xff]  }
  0x82   :  { %1717 = vmatpush1.bf16.msra.mxu0 %v2883_v14  ;;  %1889 = vmatpush1.bf16.msra.mxu1 %v2886_v15  ;;  %v3371_v14 = vld [vmem:[#allocation2 + $0x10] sm:$0xff] }
  0x83   :  { %1718 = vmatprep.subr.bf16.mxu0 %v2891_v16  ;;  %1890 = vmatprep.subr.bf16.mxu1 %v2894_v17  ;;  %v3373_v15 = vld [vmem:[#allocation2 + $0x30] sm:$0xff] }
  0x84   :  { %v2395_v16 = vcombine.high %v3371_v14, %v3373_v15  ;;  %v2973_v17 = vld [vmem:[#allocation5 + $0x420] ss:$16 sps:$4 sm:$0xff]  }
  0x86   :  { %1719 = vmatpush1.bf16.msra.mxu0 %v2889_v18  ;;  %1891 = vmatpush1.bf16.msra.mxu1 %v2892_v19  ;;  %v2976_v18 = vld [vmem:[#allocation5 + $0x428] ss:$16 sps:$4 sm:$0xff]   ;;  %v2981_v19 = vld [vmem:[#allocation5 + $0x444] ss:$16 sps:$4 sm:$0xff]  }
  0x87   :  { %1720 = vmatprep.subr.bf16.mxu0 %v2897_v20  ;;  %1892 = vmatprep.subr.bf16.mxu1 %v2900_v21  ;;  %v2984_v20 = vld [vmem:[#allocation5 + $0x44c] ss:$16 sps:$4 sm:$0xff]   ;;  %v2979_v21 = vld [vmem:[#allocation5 + $0x440] ss:$16 sps:$4 sm:$0xff]  }
  0x8a   :  { %1721 = vmatpush1.bf16.msra.mxu0 %v2895_v22  ;;  %1893 = vmatpush1.bf16.msra.mxu1 %v2898_v23  ;;  %v2982_v22 = vld [vmem:[#allocation5 + $0x448] ss:$16 sps:$4 sm:$0xff]   ;;  %v2987_v23 = vld [vmem:[#allocation5 + $0x464] ss:$16 sps:$4 sm:$0xff]  }
  0x8b   :  { %1722 = vmatprep.subr.bf16.mxu0 %v2903_v24  ;;  %1894 = vmatprep.subr.bf16.mxu1 %v2906_v25  ;;  %v2990_v24 = vld [vmem:[#allocation5 + $0x46c] ss:$16 sps:$4 sm:$0xff]   ;;  %v2985_v25 = vld [vmem:[#allocation5 + $0x460] ss:$16 sps:$4 sm:$0xff]  }
  0x8e   :  { %1723 = vmatpush1.bf16.msra.mxu0 %v2901_v26  ;;  %1895 = vmatpush1.bf16.msra.mxu1 %v2904_v27  ;;  %v2988_v26 = vld [vmem:[#allocation5 + $0x468] ss:$16 sps:$4 sm:$0xff]   ;;  %v2993_v27 = vld [vmem:[#allocation5 + $0x484] ss:$16 sps:$4 sm:$0xff]  }
  0x8f   :  { %1724 = vmatprep.subr.bf16.mxu0 %v2909_v28  ;;  %1896 = vmatprep.subr.bf16.mxu1 %v2912_v29  ;;  %v2996_v28 = vld [vmem:[#allocation5 + $0x48c] ss:$16 sps:$4 sm:$0xff]   ;;  %v2991_v29 = vld [vmem:[#allocation5 + $0x480] ss:$16 sps:$4 sm:$0xff]  }
  0x92   :  { %1725 = vmatpush1.bf16.msra.mxu0 %v2907_v32  ;;  %1897 = vmatpush1.bf16.msra.mxu1 %v2910_v33  ;;  %v3002_v32 = vld [vmem:[#allocation5 + $0x4ac] ss:$16 sps:$4 sm:$0xff]   ;;  %v2997_v33 = vld [vmem:[#allocation5 + $0x4a0] ss:$16 sps:$4 sm:$0xff]  }
  0x93   :  { %1726 = vmatprep.subr.bf16.mxu0 %v2915_v35  ;;  %1898 = vmatprep.subr.bf16.mxu1 %v2918_v36  ;;  %v3005_v35 = vld [vmem:[#allocation5 + $0x4c4] ss:$16 sps:$4 sm:$0xff]   ;;  %v3008_v36 = vld [vmem:[#allocation5 + $0x4cc] ss:$16 sps:$4 sm:$0xff]  }
  0x96   :  { %1727 = vmatpush1.bf16.msra.mxu0 %v2913_v37  ;;  %1899 = vmatpush1.bf16.msra.mxu1 %v2916_v38  ;;  %v3003_v37 = vld [vmem:[#allocation5 + $0x4c0] ss:$16 sps:$4 sm:$0xff]   ;;  %v3006_v38 = vld [vmem:[#allocation5 + $0x4c8] ss:$16 sps:$4 sm:$0xff]  }
  0x97   :  { %1728 = vmatprep.subr.bf16.mxu0 %v2921_v39  ;;  %1900 = vmatprep.subr.bf16.mxu1 %v2924_v40  ;;  %v3011_v39 = vld [vmem:[#allocation5 + $0x4e4] ss:$16 sps:$4 sm:$0xff]   ;;  %v3014_v40 = vld [vmem:[#allocation5 + $0x4ec] ss:$16 sps:$4 sm:$0xff]  }
  0x9a   :  { %1729 = vmatpush1.bf16.msra.mxu0 %v2919_v41  ;;  %1901 = vmatpush1.bf16.msra.mxu1 %v2922_v42  ;;  %v3009_v41 = vld [vmem:[#allocation5 + $0x4e0] ss:$16 sps:$4 sm:$0xff]   ;;  %v3012_v42 = vld [vmem:[#allocation5 + $0x4e8] ss:$16 sps:$4 sm:$0xff]  }
  0x9b   :  { %1730 = vmatprep.subr.bf16.mxu0 %v2927_v43  ;;  %1902 = vmatprep.subr.bf16.mxu1 %v2930_v44  ;;  %v3017_v43 = vld [vmem:[#allocation5 + $0x504] ss:$16 sps:$4 sm:$0xff]   ;;  %v3020_v44 = vld [vmem:[#allocation5 + $0x50c] ss:$16 sps:$4 sm:$0xff]  }
  0x9e   :  { %1731 = vmatpush1.bf16.msra.mxu0 %v2925_v45  ;;  %1903 = vmatpush1.bf16.msra.mxu1 %v2928_v46  ;;  %v3015_v45 = vld [vmem:[#allocation5 + $0x500] ss:$16 sps:$4 sm:$0xff]   ;;  %v3018_v46 = vld [vmem:[#allocation5 + $0x508] ss:$16 sps:$4 sm:$0xff]  }
  0x9f   :  { %1732 = vmatprep.subr.bf16.mxu0 %v2933_v47  ;;  %1904 = vmatprep.subr.bf16.mxu1 %v2936_v48  ;;  %v3023_v47 = vld [vmem:[#allocation5 + $0x524] ss:$16 sps:$4 sm:$0xff]   ;;  %v3026_v48 = vld [vmem:[#allocation5 + $0x52c] ss:$16 sps:$4 sm:$0xff]  }
  0xa2   :  { %1733 = vmatpush1.bf16.msra.mxu0 %v2931_v49  ;;  %1905 = vmatpush1.bf16.msra.mxu1 %v2934_v50  ;;  %v3021_v49 = vld [vmem:[#allocation5 + $0x520] ss:$16 sps:$4 sm:$0xff]   ;;  %v3024_v50 = vld [vmem:[#allocation5 + $0x528] ss:$16 sps:$4 sm:$0xff]  }
  0xa3   :  { %1734 = vmatprep.subr.bf16.mxu0 %v2939_v51  ;;  %1906 = vmatprep.subr.bf16.mxu1 %v2942_v52  ;;  %v3029_v51 = vld [vmem:[#allocation5 + $0x544] ss:$16 sps:$4 sm:$0xff]   ;;  %v3032_v52 = vld [vmem:[#allocation5 + $0x54c] ss:$16 sps:$4 sm:$0xff]  }
  0xa6   :  { %1735 = vmatpush1.bf16.msra.mxu0 %v2937_v53  ;;  %1907 = vmatpush1.bf16.msra.mxu1 %v2940_v54  ;;  %v3027_v53 = vld [vmem:[#allocation5 + $0x540] ss:$16 sps:$4 sm:$0xff]   ;;  %v3030_v54 = vld [vmem:[#allocation5 + $0x548] ss:$16 sps:$4 sm:$0xff]  }
  0xa7   :  { %1736 = vmatprep.subr.bf16.mxu0 %v2945_v55  ;;  %1908 = vmatprep.subr.bf16.mxu1 %v2948_v56  ;;  %v3035_v55 = vld [vmem:[#allocation5 + $0x564] ss:$16 sps:$4 sm:$0xff]   ;;  %v3038_v56 = vld [vmem:[#allocation5 + $0x56c] ss:$16 sps:$4 sm:$0xff]  }
  0xaa   :  { %1737 = vmatpush1.bf16.msra.mxu0 %v2943_v57  ;;  %1909 = vmatpush1.bf16.msra.mxu1 %v2946_v58  ;;  %v3033_v57 = vld [vmem:[#allocation5 + $0x560] ss:$16 sps:$4 sm:$0xff]   ;;  %v3036_v58 = vld [vmem:[#allocation5 + $0x568] ss:$16 sps:$4 sm:$0xff]  }
  0xab   :  { %1738 = vmatprep.subr.bf16.mxu0 %v2951_v59  ;;  %1910 = vmatprep.subr.bf16.mxu1 %v2954_v60  ;;  %v3041_v59 = vld [vmem:[#allocation5 + $0x584] ss:$16 sps:$4 sm:$0xff]   ;;  %v3044_v60 = vld [vmem:[#allocation5 + $0x58c] ss:$16 sps:$4 sm:$0xff]  }
  0xae   :  { %1739 = vmatpush1.bf16.msra.mxu0 %v2949_v61  ;;  %1911 = vmatpush1.bf16.msra.mxu1 %v2952_v62  ;;  %v3039_v61 = vld [vmem:[#allocation5 + $0x580] ss:$16 sps:$4 sm:$0xff]   ;;  %v3042_v62 = vld [vmem:[#allocation5 + $0x588] ss:$16 sps:$4 sm:$0xff]  }
  0xaf   :  { %1740 = vmatprep.subr.bf16.mxu0 %v2957_v63  ;;  %1912 = vmatprep.subr.bf16.mxu1 %v2960_v0  ;;  %v3047_v63 = vld [vmem:[#allocation5 + $0x5a4] ss:$16 sps:$4 sm:$0xff]   ;;  %v3050_v0 = vld [vmem:[#allocation5 + $0x5ac] ss:$16 sps:$4 sm:$0xff]  }
  0xb2   :  { %1741 = vmatpush1.bf16.msra.mxu0 %v2955_v1  ;;  %1913 = vmatpush1.bf16.msra.mxu1 %v2958_v2  ;;  %v3045_v1 = vld [vmem:[#allocation5 + $0x5a0] ss:$16 sps:$4 sm:$0xff]   ;;  %v3048_v2 = vld [vmem:[#allocation5 + $0x5a8] ss:$16 sps:$4 sm:$0xff]  }
  0xb3   :  { %1742 = vmatprep.subr.bf16.mxu0 %v2963_v3  ;;  %1914 = vmatprep.subr.bf16.mxu1 %v2966_v4  ;;  %v3053_v3 = vld [vmem:[#allocation5 + $0x5c4] ss:$16 sps:$4 sm:$0xff]   ;;  %v3056_v4 = vld [vmem:[#allocation5 + $0x5cc] ss:$16 sps:$4 sm:$0xff]  }
  0xb6   :  { %1743 = vmatpush1.bf16.msra.mxu0 %v2961_v5  ;;  %1915 = vmatpush1.bf16.msra.mxu1 %v2964_v6  ;;  %v3051_v5 = vld [vmem:[#allocation5 + $0x5c0] ss:$16 sps:$4 sm:$0xff]   ;;  %v3054_v6 = vld [vmem:[#allocation5 + $0x5c8] ss:$16 sps:$4 sm:$0xff]  }
  0xb7   :  { %1755 = vmatprep.subr.bf16.mxu0 %v2969_v7  ;;  %1927 = vmatprep.subr.bf16.mxu1 %v2972_v8  ;;  %v3059_v7 = vld [vmem:[#allocation5 + $0x5e4] ss:$16 sps:$4 sm:$0xff]   ;;  %v3062_v8 = vld [vmem:[#allocation5 + $0x5ec] ss:$16 sps:$4 sm:$0xff]  }
  0xb9   :  { %1745 = vmatmul.mubr.bf16.vlgmr.msra.gmra.mrb[0].mxu0 %v2392_v9  ;;  %1917 = vmatmul.mubr.bf16.vlgmr.msra.gmra.mrb[0].mxu1 %v2392_v9  ;;  %v3057_v9 = vld [vmem:[#allocation5 + $0x5e0] ss:$16 sps:$4 sm:$0xff]  }
  0xba   :  { %1756 = vmatpush1.bf16.msra.mxu0 %v2967_v10  ;;  %1928 = vmatpush1.bf16.msra.mxu1 %v2970_v11  ;;  %v3060_v10 = vld [vmem:[#allocation5 + $0x5e8] ss:$16 sps:$4 sm:$0xff]   ;;  %v3065_v11 = vld [vmem:[#allocation5 + $0x604] ss:$16 sps:$4 sm:$0xff]  }
  0xbb   :  { %1757 = vmatprep.subr.bf16.mxu0 %v2975_v12  ;;  %1929 = vmatprep.subr.bf16.mxu1 %v2978_v13  ;;  %v3068_v12 = vld [vmem:[#allocation5 + $0x60c] ss:$16 sps:$4 sm:$0xff]   ;;  %v3063_v13 = vld [vmem:[#allocation5 + $0x600] ss:$16 sps:$4 sm:$0xff]  }
  0xbc   :  { %1787 = vmatprep.mubr.bf16.mxu0 %v2395_v16  ;;  %1959 = vmatprep.mubr.bf16.mxu1 %v2395_v16  ;;  %v3066_v16 = vld [vmem:[#allocation5 + $0x608] ss:$16 sps:$4 sm:$0xff]  }
  0xbe   :  { %1758 = vmatpush1.bf16.msra.mxu0 %v2973_v17  ;;  %1930 = vmatpush1.bf16.msra.mxu1 %v2976_v18  ;;  %v3377_v17 = vld [vmem:[#allocation2 + $0x18] sm:$0xff]  ;;  %v2394_v18 = vcombine.low %v3371_v14, %v3373_v15  ;;  %v3075_v14 = vld [vmem:[#allocation5 + $0x640] ss:$16 sps:$4 sm:$0xff]  }
  0xbf   :  { %1759 = vmatprep.subr.bf16.mxu0 %v2981_v19  ;;  %1931 = vmatprep.subr.bf16.mxu1 %v2984_v20  ;;  %v3381_v19 = vld [vmem:[#allocation2 + $0x38] sm:$0xff]  ;;  %v3071_v20 = vld [vmem:[#allocation5 + $0x624] ss:$16 sps:$4 sm:$0xff]  }
  0xc0   :  { %v3078_v15 = vld [vmem:[#allocation5 + $0x648] ss:$16 sps:$4 sm:$0xff]  }
  0xc2   :  { %1760 = vmatpush1.bf16.msra.mxu0 %v2979_v21  ;;  %1932 = vmatpush1.bf16.msra.mxu1 %v2982_v22  ;;  %v3074_v21 = vld [vmem:[#allocation5 + $0x62c] ss:$16 sps:$4 sm:$0xff]   ;;  %v3069_v22 = vld [vmem:[#allocation5 + $0x620] ss:$16 sps:$4 sm:$0xff]  }
  0xc3   :  { %1761 = vmatprep.subr.bf16.mxu0 %v2987_v23  ;;  %1933 = vmatprep.subr.bf16.mxu1 %v2990_v24  ;;  %v3072_v23 = vld [vmem:[#allocation5 + $0x628] ss:$16 sps:$4 sm:$0xff]   ;;  %v2397_v24 = vcombine.high %v3377_v17, %v3381_v19 }
  0xc6   :  { %1762 = vmatpush1.bf16.msra.mxu0 %v2985_v25  ;;  %1934 = vmatpush1.bf16.msra.mxu1 %v2988_v26  ;;  %v3077_v25 = vld [vmem:[#allocation5 + $0x644] ss:$16 sps:$4 sm:$0xff]   ;;  %v3080_v26 = vld [vmem:[#allocation5 + $0x64c] ss:$16 sps:$4 sm:$0xff]  }
  0xc7   :  { %1763 = vmatprep.subr.bf16.mxu0 %v2993_v27  ;;  %1935 = vmatprep.subr.bf16.mxu1 %v2996_v28  ;;  %v3083_v27 = vld [vmem:[#allocation5 + $0x664] ss:$16 sps:$4 sm:$0xff]   ;;  %v3086_v28 = vld [vmem:[#allocation5 + $0x66c] ss:$16 sps:$4 sm:$0xff]  }
  0xca   :  { %1764 = vmatpush1.bf16.msra.mxu0 %v2991_v29  ;;  %1936 = vmatpush1.bf16.msra.mxu1 %v2994_v30  ;;  %v3081_v29 = vld [vmem:[#allocation5 + $0x660] ss:$16 sps:$4 sm:$0xff]   ;;  %v3084_v30 = vld [vmem:[#allocation5 + $0x668] ss:$16 sps:$4 sm:$0xff]  }
  0xcb   :  { %1765 = vmatprep.subr.bf16.mxu0 %v2999_v31  ;;  %1937 = vmatprep.subr.bf16.mxu1 %v3002_v32  ;;  %v3089_v31 = vld [vmem:[#allocation5 + $0x684] ss:$16 sps:$4 sm:$0xff]   ;;  %v3092_v32 = vld [vmem:[#allocation5 + $0x68c] ss:$16 sps:$4 sm:$0xff]  }
  0xce   :  { %1766 = vmatpush1.bf16.msra.mxu0 %v2997_v33  ;;  %1938 = vmatpush1.bf16.msra.mxu1 %v3000_v34  ;;  %v3087_v33 = vld [vmem:[#allocation5 + $0x680] ss:$16 sps:$4 sm:$0xff]   ;;  %v3090_v34 = vld [vmem:[#allocation5 + $0x688] ss:$16 sps:$4 sm:$0xff]  }
  0xcf   :  { %1767 = vmatprep.subr.bf16.mxu0 %v3005_v35  ;;  %1939 = vmatprep.subr.bf16.mxu1 %v3008_v36  ;;  %v3095_v35 = vld [vmem:[#allocation5 + $0x6a4] ss:$16 sps:$4 sm:$0xff]   ;;  %v3098_v36 = vld [vmem:[#allocation5 + $0x6ac] ss:$16 sps:$4 sm:$0xff]  }
  0xd2   :  { %1768 = vmatpush1.bf16.msra.mxu0 %v3003_v37  ;;  %1940 = vmatpush1.bf16.msra.mxu1 %v3006_v38  ;;  %v3093_v37 = vld [vmem:[#allocation5 + $0x6a0] ss:$16 sps:$4 sm:$0xff]   ;;  %v3096_v38 = vld [vmem:[#allocation5 + $0x6a8] ss:$16 sps:$4 sm:$0xff]  }
  0xd3   :  { %1769 = vmatprep.subr.bf16.mxu0 %v3011_v39  ;;  %1941 = vmatprep.subr.bf16.mxu1 %v3014_v40  ;;  %v3101_v39 = vld [vmem:[#allocation5 + $0x6c4] ss:$16 sps:$4 sm:$0xff]   ;;  %v3104_v40 = vld [vmem:[#allocation5 + $0x6cc] ss:$16 sps:$4 sm:$0xff]  }
  0xd6   :  { %1770 = vmatpush1.bf16.msra.mxu0 %v3009_v41  ;;  %1942 = vmatpush1.bf16.msra.mxu1 %v3012_v42  ;;  %v3099_v41 = vld [vmem:[#allocation5 + $0x6c0] ss:$16 sps:$4 sm:$0xff]   ;;  %v3102_v42 = vld [vmem:[#allocation5 + $0x6c8] ss:$16 sps:$4 sm:$0xff]  }
  0xd7   :  { %1771 = vmatprep.subr.bf16.mxu0 %v3017_v43  ;;  %1943 = vmatprep.subr.bf16.mxu1 %v3020_v44  ;;  %v3107_v43 = vld [vmem:[#allocation5 + $0x6e4] ss:$16 sps:$4 sm:$0xff]   ;;  %v3110_v44 = vld [vmem:[#allocation5 + $0x6ec] ss:$16 sps:$4 sm:$0xff]  }
  0xda   :  { %1772 = vmatpush1.bf16.msra.mxu0 %v3015_v45  ;;  %1944 = vmatpush1.bf16.msra.mxu1 %v3018_v46  ;;  %v3105_v45 = vld [vmem:[#allocation5 + $0x6e0] ss:$16 sps:$4 sm:$0xff]   ;;  %v3108_v46 = vld [vmem:[#allocation5 + $0x6e8] ss:$16 sps:$4 sm:$0xff]  }
  0xdb   :  { %1773 = vmatprep.subr.bf16.mxu0 %v3023_v47  ;;  %1945 = vmatprep.subr.bf16.mxu1 %v3026_v48  ;;  %v3113_v47 = vld [vmem:[#allocation5 + $0x704] ss:$16 sps:$4 sm:$0xff]   ;;  %v3116_v48 = vld [vmem:[#allocation5 + $0x70c] ss:$16 sps:$4 sm:$0xff]  }
  0xde   :  { %1774 = vmatpush1.bf16.msra.mxu0 %v3021_v49  ;;  %1946 = vmatpush1.bf16.msra.mxu1 %v3024_v50  ;;  %v3111_v49 = vld [vmem:[#allocation5 + $0x700] ss:$16 sps:$4 sm:$0xff]   ;;  %v3114_v50 = vld [vmem:[#allocation5 + $0x708] ss:$16 sps:$4 sm:$0xff]  }
  0xdf   :  { %1775 = vmatprep.subr.bf16.mxu0 %v3029_v51  ;;  %1947 = vmatprep.subr.bf16.mxu1 %v3032_v52  ;;  %v3119_v51 = vld [vmem:[#allocation5 + $0x724] ss:$16 sps:$4 sm:$0xff]   ;;  %v3122_v52 = vld [vmem:[#allocation5 + $0x72c] ss:$16 sps:$4 sm:$0xff]  }
  0xe2   :  { %1776 = vmatpush1.bf16.msra.mxu0 %v3027_v53  ;;  %1948 = vmatpush1.bf16.msra.mxu1 %v3030_v54  ;;  %v3117_v53 = vld [vmem:[#allocation5 + $0x720] ss:$16 sps:$4 sm:$0xff]   ;;  %v3120_v54 = vld [vmem:[#allocation5 + $0x728] ss:$16 sps:$4 sm:$0xff]  }
  0xe3   :  { %1777 = vmatprep.subr.bf16.mxu0 %v3035_v55  ;;  %1949 = vmatprep.subr.bf16.mxu1 %v3038_v56  ;;  %v3125_v55 = vld [vmem:[#allocation5 + $0x744] ss:$16 sps:$4 sm:$0xff]   ;;  %v3128_v56 = vld [vmem:[#allocation5 + $0x74c] ss:$16 sps:$4 sm:$0xff]  }
  0xe6   :  { %1778 = vmatpush1.bf16.msra.mxu0 %v3033_v57  ;;  %1950 = vmatpush1.bf16.msra.mxu1 %v3036_v58  ;;  %v3123_v57 = vld [vmem:[#allocation5 + $0x740] ss:$16 sps:$4 sm:$0xff]   ;;  %v3126_v58 = vld [vmem:[#allocation5 + $0x748] ss:$16 sps:$4 sm:$0xff]  }
  0xe7   :  { %1779 = vmatprep.subr.bf16.mxu0 %v3041_v59  ;;  %1951 = vmatprep.subr.bf16.mxu1 %v3044_v60  ;;  %v3131_v59 = vld [vmem:[#allocation5 + $0x764] ss:$16 sps:$4 sm:$0xff]   ;;  %v3134_v60 = vld [vmem:[#allocation5 + $0x76c] ss:$16 sps:$4 sm:$0xff]  }
  0xea   :  { %1780 = vmatpush1.bf16.msra.mxu0 %v3039_v61  ;;  %1952 = vmatpush1.bf16.msra.mxu1 %v3042_v62  ;;  %v3129_v61 = vld [vmem:[#allocation5 + $0x760] ss:$16 sps:$4 sm:$0xff]   ;;  %v3132_v62 = vld [vmem:[#allocation5 + $0x768] ss:$16 sps:$4 sm:$0xff]  }
  0xeb   :  { %1781 = vmatprep.subr.bf16.mxu0 %v3047_v63  ;;  %1953 = vmatprep.subr.bf16.mxu1 %v3050_v0  ;;  %v3137_v63 = vld [vmem:[#allocation5 + $0x784] ss:$16 sps:$4 sm:$0xff]   ;;  %v3140_v0 = vld [vmem:[#allocation5 + $0x78c] ss:$16 sps:$4 sm:$0xff]  }
  0xee   :  { %1782 = vmatpush1.bf16.msra.mxu0 %v3045_v1  ;;  %1954 = vmatpush1.bf16.msra.mxu1 %v3048_v2  ;;  %v3135_v1 = vld [vmem:[#allocation5 + $0x780] ss:$16 sps:$4 sm:$0xff]   ;;  %v3138_v2 = vld [vmem:[#allocation5 + $0x788] ss:$16 sps:$4 sm:$0xff]  }
  0xef   :  { %1783 = vmatprep.subr.bf16.mxu0 %v3053_v3  ;;  %1955 = vmatprep.subr.bf16.mxu1 %v3056_v4  ;;  %v3143_v3 = vld [vmem:[#allocation5 + $0x7a4] ss:$16 sps:$4 sm:$0xff]   ;;  %v3146_v4 = vld [vmem:[#allocation5 + $0x7ac] ss:$16 sps:$4 sm:$0xff]  }
  0xf2   :  { %1784 = vmatpush1.bf16.msra.mxu0 %v3051_v5  ;;  %1956 = vmatpush1.bf16.msra.mxu1 %v3054_v6  ;;  %v3141_v5 = vld [vmem:[#allocation5 + $0x7a0] ss:$16 sps:$4 sm:$0xff]   ;;  %v3144_v6 = vld [vmem:[#allocation5 + $0x7a8] ss:$16 sps:$4 sm:$0xff]  }
  0xf3   :  { %1785 = vmatprep.subr.bf16.mxu0 %v3059_v7  ;;  %1957 = vmatprep.subr.bf16.mxu1 %v3062_v8  ;;  %v3149_v7 = vld [vmem:[#allocation5 + $0x7c4] ss:$16 sps:$4 sm:$0xff]   ;;  %v3152_v8 = vld [vmem:[#allocation5 + $0x7cc] ss:$16 sps:$4 sm:$0xff]  }
  0xf6   :  { %1786 = vmatpush1.bf16.msra.mxu0 %v3057_v9  ;;  %1958 = vmatpush1.bf16.msra.mxu1 %v3060_v10  ;;  %v3147_v9 = vld [vmem:[#allocation5 + $0x7c0] ss:$16 sps:$4 sm:$0xff]   ;;  %v3150_v10 = vld [vmem:[#allocation5 + $0x7c8] ss:$16 sps:$4 sm:$0xff]  }
  0xf7   :  { %1798 = vmatprep.subr.bf16.mxu0 %v3065_v11  ;;  %1970 = vmatprep.subr.bf16.mxu1 %v3068_v12  ;;  %v3155_v11 = vld [vmem:[#allocation5 + $0x7e4] ss:$16 sps:$4 sm:$0xff]   ;;  %v3158_v12 = vld [vmem:[#allocation5 + $0x7ec] ss:$16 sps:$4 sm:$0xff]  }
  0xf9   :  { %1788 = vmatmul.mubr.bf16.vlgmr.msra.gmra.mrb[0].mxu0 %v2394_v18  ;;  %1960 = vmatmul.mubr.bf16.vlgmr.msra.gmra.mrb[0].mxu1 %v2394_v18  ;;  %v3159_v18 = vld [vmem:[#allocation7 + $0x40] sm:$0xff]  }
  0xfa   :  { %1799 = vmatpush1.bf16.msra.mxu0 %v3063_v13  ;;  %1971 = vmatpush1.bf16.msra.mxu1 %v3066_v16  ;;  %v3153_v13 = vld [vmem:[#allocation5 + $0x7e0] ss:$16 sps:$4 sm:$0xff]   ;;  %v3156_v16 = vld [vmem:[#allocation5 + $0x7e8] ss:$16 sps:$4 sm:$0xff]  }
  0xfb   :  { %1800 = vmatprep.subr.bf16.mxu0 %v3071_v20  ;;  %1972 = vmatprep.subr.bf16.mxu1 %v3074_v21  ;;  %v3160_v20 = vld [vmem:[#allocation7 + $0xc0] sm:$0xff]   ;;  %v2396_v21 = vcombine.low %v3377_v17, %v3381_v19  ;;  %v3169_v17 = vld [vmem:[#allocation7 + $0x10] sm:$0xff]  }
  0xfc   :  { %1830 = vmatprep.mubr.bf16.mxu0 %v2397_v24  ;;  %2002 = vmatprep.mubr.bf16.mxu1 %v2397_v24  ;;  %v3163_v24 = vld [vmem:[#allocation7 + $0x48] sm:$0xff]   ;;  %v3170_v19 = vld [vmem:[#allocation7 + $0x90] sm:$0xff]  }
  0xfe   :  { %1801 = vmatpush1.bf16.msra.mxu0 %v3069_v22  ;;  %1973 = vmatpush1.bf16.msra.mxu1 %v3072_v23  ;;  %v3161_v22 = vld [vmem:[#allocation7] sm:$0xff]  }
  0xff   :  { %1802 = vmatprep.subr.bf16.mxu0 %v3077_v25  ;;  %1974 = vmatprep.subr.bf16.mxu1 %v3080_v26  ;;  %v3162_v23 = vld [vmem:[#allocation7 + $0x80] sm:$0xff]   ;;  %v3164_v25 = vld [vmem:[#allocation7 + $0xc8] sm:$0xff]  }
 0x100   :  { %v3165_v26 = vld [vmem:[#allocation7 + $0x8] sm:$0xff]  }
 0x102   :  { %1803 = vmatpush1.bf16.msra.mxu0 %v3075_v14  ;;  %1975 = vmatpush1.bf16.msra.mxu1 %v3078_v15  ;;  %v3166_v14 = vld [vmem:[#allocation7 + $0x88] sm:$0xff]   ;;  %v3167_v15 = vld [vmem:[#allocation7 + $0x50] sm:$0xff]  }
 0x103   :  { %1804 = vmatprep.subr.bf16.mxu0 %v3083_v27  ;;  %1976 = vmatprep.subr.bf16.mxu1 %v3086_v28  ;;  %v3168_v27 = vld [vmem:[#allocation7 + $0xd0] sm:$0xff]   ;;  %v3171_v28 = vld [vmem:[#allocation7 + $0x58] sm:$0xff]  }
 0x106   :  { %1805 = vmatpush1.bf16.msra.mxu0 %v3081_v29  ;;  %1977 = vmatpush1.bf16.msra.mxu1 %v3084_v30  ;;  %v3172_v29 = vld [vmem:[#allocation7 + $0xd8] sm:$0xff]  }
 0x107   :  { %1806 = vmatprep.subr.bf16.mxu0 %v3089_v31  ;;  %1978 = vmatprep.subr.bf16.mxu1 %v3092_v32  ;;  %v3173_v30 = vld [vmem:[#allocation7 + $0x18] sm:$0xff]   ;;  %v3175_v32 = vld [vmem:[#allocation7 + $0x60] sm:$0xff]  }
 0x108   :  { %v3174_v31 = vld [vmem:[#allocation7 + $0x98] sm:$0xff]  }
 0x10a   :  { %1807 = vmatpush1.bf16.msra.mxu0 %v3087_v33  ;;  %1979 = vmatpush1.bf16.msra.mxu1 %v3090_v34  ;;  %v3176_v33 = vld [vmem:[#allocation7 + $0xe0] sm:$0xff]  }
 0x10b   :  { %1808 = vmatprep.subr.bf16.mxu0 %v3095_v35  ;;  %1980 = vmatprep.subr.bf16.mxu1 %v3098_v36  ;;  %v3177_v34 = vld [vmem:[#allocation7 + $0x20] sm:$0xff]   ;;  %v3179_v36 = vld [vmem:[#allocation7 + $0x68] sm:$0xff]  }
 0x10c   :  { %v3178_v35 = vld [vmem:[#allocation7 + $0xa0] sm:$0xff]  }
 0x10e   :  { %1809 = vmatpush1.bf16.msra.mxu0 %v3093_v37  ;;  %1981 = vmatpush1.bf16.msra.mxu1 %v3096_v38  ;;  %v3180_v37 = vld [vmem:[#allocation7 + $0xe8] sm:$0xff]  }
 0x10f   :  { %1810 = vmatprep.subr.bf16.mxu0 %v3101_v39  ;;  %1982 = vmatprep.subr.bf16.mxu1 %v3104_v40  ;;  %v3181_v38 = vld [vmem:[#allocation7 + $0x28] sm:$0xff]   ;;  %v3183_v40 = vld [vmem:[#allocation7 + $0x70] sm:$0xff]  }
 0x110   :  { %v3182_v39 = vld [vmem:[#allocation7 + $0xa8] sm:$0xff]  }
 0x112   :  { %1811 = vmatpush1.bf16.msra.mxu0 %v3099_v41  ;;  %1983 = vmatpush1.bf16.msra.mxu1 %v3102_v42  ;;  %v3184_v41 = vld [vmem:[#allocation7 + $0xf0] sm:$0xff]  }
 0x113   :  { %1812 = vmatprep.subr.bf16.mxu0 %v3107_v43  ;;  %1984 = vmatprep.subr.bf16.mxu1 %v3110_v44  ;;  %v3185_v42 = vld [vmem:[#allocation7 + $0x30] sm:$0xff]   ;;  %v3187_v44 = vld [vmem:[#allocation7 + $0x78] sm:$0xff]  }
 0x114   :  { %v3186_v43 = vld [vmem:[#allocation7 + $0xb0] sm:$0xff]  }
 0x116   :  { %1813 = vmatpush1.bf16.msra.mxu0 %v3105_v45  ;;  %1985 = vmatpush1.bf16.msra.mxu1 %v3108_v46  ;;  %v3188_v45 = vld [vmem:[#allocation7 + $0xf8] sm:$0xff]  }
 0x117   :  { %1814 = vmatprep.subr.bf16.mxu0 %v3113_v47  ;;  %1986 = vmatprep.subr.bf16.mxu1 %v3116_v48  ;;  %v3189_v46 = vld [vmem:[#allocation7 + $0x38] sm:$0xff]   ;;  %v329_v48 = vlaneseq }
 0x118   :  { %v3190_v47 = vld [vmem:[#allocation7 + $0xb8] sm:$0xff]  }
 0x11a   :  { %1815 = vmatpush1.bf16.msra.mxu0 %v3111_v49  ;;  %1987 = vmatpush1.bf16.msra.mxu1 %v3114_v50  ;;  %v330_v49 = vshrl.u32 %v329_v48, 7 }
 0x11b   :  { %1816 = vmatprep.subr.bf16.mxu0 %v3119_v51  ;;  %1988 = vmatprep.subr.bf16.mxu1 %v3122_v52  ;;  %v327_v52 = vld [vmem:[%s3407_s2] sm:$0xf] }
 0x11c   :  { %v331_v50 = vsub.s32 0, %v330_v49  ;;  %v339_v51 = vsub.s32 2, %v330_v49 }
 0x11e   :  { %1817 = vmatpush1.bf16.msra.mxu0 %v3117_v53  ;;  %1989 = vmatpush1.bf16.msra.mxu1 %v3120_v54  ;;  %v335_v53 = vsub.s32 1, %v330_v49  ;;  %v343_v54 = vsub.s32 3, %v330_v49 }
 0x11f   :  { %1818 = vmatprep.subr.bf16.mxu0 %v3125_v55  ;;  %1990 = vmatprep.subr.bf16.mxu1 %v3128_v56  ;;  %v332_v55 = vrot.slane %v327_v52, %v331_v50  ;;  %v340_v56 = vrot.slane %v327_v52, %v339_v51 }
 0x122   :  { %1819 = vmatpush1.bf16.msra.mxu0 %v3123_v57  ;;  %1991 = vmatpush1.bf16.msra.mxu1 %v3126_v58  ;;  %v336_v57 = vrot.slane %v327_v52, %v335_v53  ;;  %v344_v58 = vrot.slane %v327_v52, %v343_v54 }
 0x123   :  { %1820 = vmatprep.subr.bf16.mxu0 %v3131_v59  ;;  %1992 = vmatprep.subr.bf16.mxu1 %v3134_v60 }
 0x126   :  { %1821 = vmatpush1.bf16.msra.mxu0 %v3129_v61  ;;  %1993 = vmatpush1.bf16.msra.mxu1 %v3132_v62 }
 0x127   :  { %1822 = vmatprep.subr.bf16.mxu0 %v3137_v63  ;;  %1994 = vmatprep.subr.bf16.mxu1 %v3140_v0 }
 0x12a   :  { %1823 = vmatpush1.bf16.msra.mxu0 %v3135_v1  ;;  %1995 = vmatpush1.bf16.msra.mxu1 %v3138_v2 }
 0x12b   :  { %1824 = vmatprep.subr.bf16.mxu0 %v3143_v3  ;;  %1996 = vmatprep.subr.bf16.mxu1 %v3146_v4 }
 0x12e   :  { %1825 = vmatpush1.bf16.msra.mxu0 %v3141_v5  ;;  %1997 = vmatpush1.bf16.msra.mxu1 %v3144_v6 }
 0x12f   :  { %1826 = vmatprep.subr.bf16.mxu0 %v3149_v7  ;;  %1998 = vmatprep.subr.bf16.mxu1 %v3152_v8 }
 0x132   :  { %1827 = vmatpush1.bf16.msra.mxu0 %v3147_v9  ;;  %1999 = vmatpush1.bf16.msra.mxu1 %v3150_v10 }
 0x133   :  { %1828 = vmatprep.subr.bf16.mxu0 %v3155_v11  ;;  %2000 = vmatprep.subr.bf16.mxu1 %v3158_v12 }
 0x136   :  { %1829 = vmatpush1.bf16.msra.mxu0 %v3153_v13  ;;  %2001 = vmatpush1.bf16.msra.mxu1 %v3156_v16 }
 0x137   :  { %2687 = vmatprep.subr.bf16.mxu0 %v3159_v18  ;;  %2709 = vmatprep.subr.bf16.mxu1 %v3160_v20 }
 0x139   :  { %1831 = vmatmul.mubr.bf16.vlgmr.msra.gmra.mrb[0].mxu0 %v2396_v21  ;;  %2003 = vmatmul.mubr.bf16.vlgmr.msra.gmra.mrb[0].mxu1 %v2396_v21 }
 0x13a   :  { %2688 = vmatpush3.bf16.msra.mxu0 %v3161_v22  ;;  %2710 = vmatpush3.bf16.msra.mxu1 %v3162_v23 }
 0x13b   :  { %2689 = vmatprep.subr.bf16.mxu0 %v3163_v24  ;;  %2711 = vmatprep.subr.bf16.mxu1 %v3164_v25 }
 0x13e   :  { %2690 = vmatpush3.bf16.msra.mxu0 %v3165_v26  ;;  %2712 = vmatpush3.bf16.msra.mxu1 %v3166_v14 }
 0x13f   :  { %2691 = vmatprep.subr.bf16.mxu0 %v3167_v15  ;;  %2713 = vmatprep.subr.bf16.mxu1 %v3168_v27  ;;  %v2654_v27 = vld [vmem:[%s3409_s4] ss:$0 sm:$0xff]  ;;  %s3257_s4 = scalar_lea.vmem %s2378_s11, 256 }
 0x140   :  { %p3258_p10 = scmp.ne.s32.totalorder %s2378_s11, %s3257_s4  ;;  %p3263_p12 = scmp.lt.s32.totalorder %s3257_s4, %s3257_s4 }
 0x142   :  { %2692 = vmatpush3.bf16.msra.mxu0 %v3169_v17  ;;  %2714 = vmatpush3.bf16.msra.mxu1 %v3170_v19  ;;  %p3264_p13 = por %p3263_p12, %p3262_p11 }
 0x143   :  { %2693 = vmatprep.subr.bf16.mxu0 %v3171_v28  ;;  %2715 = vmatprep.subr.bf16.mxu1 %v3172_v29 }
 0x144   :  { %p3265_p0 = pnand %p3264_p13, %p3258_p10 }
 0x146   :  { %2694 = vmatpush3.bf16.msra.mxu0 %v3173_v30  ;;  %2716 = vmatpush3.bf16.msra.mxu1 %v3174_v31 }
 0x147   :  { %2695 = vmatprep.subr.bf16.mxu0 %v3175_v32  ;;  %2717 = vmatprep.subr.bf16.mxu1 %v3176_v33 }
 0x14a   :  { %2696 = vmatpush3.bf16.msra.mxu0 %v3177_v34  ;;  %2718 = vmatpush3.bf16.msra.mxu1 %v3178_v35 }
 0x14b   :  { %2697 = vmatprep.subr.bf16.mxu0 %v3179_v36  ;;  %2719 = vmatprep.subr.bf16.mxu1 %v3180_v37 }
 0x14e   :  { %2698 = vmatpush3.bf16.msra.mxu0 %v3181_v38  ;;  %2720 = vmatpush3.bf16.msra.mxu1 %v3182_v39 }
 0x14f   :  { %2699 = vmatprep.subr.bf16.mxu0 %v3183_v40  ;;  %2721 = vmatprep.subr.bf16.mxu1 %v3184_v41 }
 0x152   :  { %2700 = vmatpush3.bf16.msra.mxu0 %v3185_v42  ;;  %2722 = vmatpush3.bf16.msra.mxu1 %v3186_v43 }
 0x153   :  { %2701 = vmatprep.subr.bf16.mxu0 %v3187_v44  ;;  %2723 = vmatprep.subr.bf16.mxu1 %v3188_v45 }
 0x156   :  { %2702 = vmatpush3.bf16.msra.mxu0 %v3189_v46  ;;  %2724 = vmatpush3.bf16.msra.mxu1 %v3190_v47 }
 0x20c   :  { %v1832_v59 = vpop.f32.mrb[0].mxu0  ;;  %v2004_v60 = vpop.f32.mrb[0].mxu1 }
 0x20d   :  { %v2731_v61 = vadd.f32 %v1832_v59, %v332_v55  ;;  %v2735_v62 = vadd.f32 %v2004_v60, %v340_v56  ;;  %v1834_v63 = vpop.f32.mrb[1].mxu0  ;;  %v2006_v0 = vpop.f32.mrb[1].mxu1 }
 0x20e   :  { %v2732_v1 = vadd.f32 %v1834_v63, %v336_v57  ;;  %v2736_v2 = vadd.f32 %v2006_v0, %v344_v58  ;;  %v1836_v3 = vpop.f32.mrb[2].mxu0  ;;  %v2008_v4 = vpop.f32.mrb[2].mxu1 }
 0x20f   :  { %v2733_v5 = vadd.f32 %v1836_v3, %v332_v55  ;;  %v2737_v6 = vadd.f32 %v2008_v4, %v340_v56  ;;  %v1838_v7 = vpop.f32.mrb[3].mxu0  ;;  %v2010_v8 = vpop.f32.mrb[3].mxu1  ;;  %v2013_v11 = vmax.f32 %v2731_v61, 0.0  ;;  %v2015_v12 = vmax.f32 %v2735_v62, 0.0 }
 0x210   :  { %v2734_v9 = vadd.f32 %v1838_v7, %v336_v57  ;;  %v2738_v10 = vadd.f32 %v2010_v8, %v344_v58  ;;  %v2014_v18 = vmax.f32 %v2732_v1, 0.0  ;;  %v2016_v20 = vmax.f32 %v2736_v2, 0.0 }
 0x211   :  { %v2017_v13 = vmax.f32 %v2733_v5, 0.0  ;;  %v2019_v16 = vmax.f32 %v2737_v6, 0.0 }
 0x212   :  { %v2018_v21 = vmax.f32 %v2734_v9, 0.0  ;;  %v2020_v22 = vmax.f32 %v2738_v10, 0.0 }
 0x213   :  { %v2021_v23 = vpack.c.bf16 %v2017_v13, %v2013_v11  ;;  %v2023_v24 = vpack.c.bf16 %v2019_v16, %v2015_v12 }
 0x214   :  { %v2022_v25 = vpack.c.bf16 %v2018_v21, %v2014_v18  ;;  %v2024_v26 = vpack.c.bf16 %v2020_v22, %v2016_v20 }
 0x216   :  { %2320 = vmatprep.mubr.bf16.mxu0 %v2022_v25  ;;  %2361 = vmatprep.mubr.bf16.mxu1 %v2024_v26 }
 0x217   :  { %2321 = vmatmul.mubr.bf16.vlgmr.msra.gmra.mrb[4].mxu0 %v2021_v23  ;;  %2362 = vmatmul.mubr.bf16.vlgmr.msra.gmra.mrb[4].mxu1 %v2023_v24 }
 0x2ea   :  { %v2703_v14 = vpop.f32.mrb[4].mxu0  ;;  %v2725_v15 = vpop.f32.mrb[4].mxu1 }
 0x2eb   :  { %v2704_v17 = vpop.f32.mrb[5].mxu0  ;;  %v2726_v19 = vpop.f32.mrb[5].mxu1 }
 0x2ec   :  { %v2705_v28 = vadd.f32 %v2704_v17, %v2703_v14  ;;  %v2727_v29 = vadd.f32 %v2726_v19, %v2725_v15  ;;  %v2706_v30 = vpop.f32.mrb[6].mxu0  ;;  %v2728_v31 = vpop.f32.mrb[6].mxu1 }
 0x2ed   :  { %v2707_v32 = vpop.f32.mrb[7].mxu0  ;;  %v2729_v33 = vpop.f32.mrb[7].mxu1 }
 0x2ee   :  { %v2323_v34 = vadd.f32 %v2705_v28, %v2654_v27  ;;  %v2708_v35 = vadd.f32 %v2707_v32, %v2706_v30  ;;  %v2730_v36 = vadd.f32 %v2729_v33, %v2728_v31 }
 0x2f0   :  { %v2364_v37 = vadd.f32 %v2727_v29, %v2323_v34  ;;  %v2326_v38 = vadd.f32 %v2708_v35, %v2654_v27 }
 0x2f2   :  { %2370 = vst [vmem:[#allocation8] sm:$0xff] %v2364_v37  ;;  %v2367_v39 = vadd.f32 %v2730_v36, %v2326_v38 }
 0x2f4   :  { %2371 = vst [vmem:[#allocation8 + $0x8] sm:$0xff] %v2367_v39 }
 0x2f5   :  { %3268 = shalt.err (!%p3265_p0)
}
 0x2f6   :  { %s3269_s14 = scalar_lea.hbm %s3410_s5, 256 }
 0x2f7   :  { %p3270_p1 = scmp.ne.s32.totalorder %s3410_s5, %s3269_s14  ;;  %p3273_p2 = scmp.lt.u32.totalorder %s3269_s14, %s3410_s5 }
 0x2f9   :  { %p3275_p3 = pnand %p3273_p2, %p3270_p1 }
 0x2fb   :  { %3278 = shalt.err (!%p3275_p3)
}
 0x2fc   :  { %s3295_s18 = smov 128   ;;  %s3296_s19 = smov 8  }
 0x2fd   :  { %2383 = dma.vmem_to_hbm [thread:$0]  %s2378_s11, 256, %s3410_s5, [#allocation4], %s3295_s18, %s3295_s18, %s3296_s19  }
 0x2fe   :  { %3283 = dma.done.wait [#allocation4], 256  }
 0x2ff   :  { %3284 = vsyncadd [#allocation4], 4294967040 }
 0x300   :  { %2387 = vsyncpa [#allocation3], 1 }
 0x301   :  { %2388 = vsyncpa [#allocation6], 1 }
 0x302   :  { %2389 = vsyncpa [#allocation4], 1 }

</bundles_post_ra>
